<compile_context>
chip_gen: v7x
topology: tpu7x:2x2x1
jax: 0.10.0
libtpu: 0.0.40
codegen_flags: <defaults>
</compile_context>

<pallas_src>
import functools
import math

import jax
import jax.numpy as jnp
from jax import lax
from jax.experimental import pallas as pl
from jax.experimental.pallas import tpu as pltpu

QDIM = 128  # hidden width of the q projection (fixed by the module)


def _cdiv(a, b):
    return -(-a // b)


def _round_up(x, m):
    return _cdiv(x, m) * m


def _device_defaults():
    """Returns (vmem pipeline budget bytes, vmem limit cap bytes, num tensorcores)."""
    kind = ""
    try:
        kind = jax.devices()[0].device_kind.lower()
    except Exception:
        pass
    if "v7" in kind:
        # v7x: 64 MiB physical VMEM per TensorCore, 2 TCs per chip.
        return 24 * 1024 * 1024, 52 * 1024 * 1024, 2
    # v5e / v6e: 128 MiB physical VMEM, 1 TC.
    return 48 * 1024 * 1024, 100 * 1024 * 1024, 1


def _pick_tile_n(d, k, compute_itemsize, slab_itemsize, budget):
    """tile_n from a VMEM byte budget (kernel is HBM-bound: bigger tiles amortize
    the ~0.35us per-grid-step fixed cost)."""
    per_row = (2 * d * compute_itemsize            # double-buffered feats block
               + QDIM * (4 + compute_itemsize)     # f32 q-proj result + compute-dtype copy
               + 2 * k * slab_itemsize             # double-buffered logits slab
               + 4 * k * 4)                        # f32 s / p / mask temporaries
    tile = budget // per_row
    tile = min(tile, (8 * 1024 * 1024) // max(1, d * compute_itemsize))  # feats block <= 8 MiB
    tile = min(tile, 16384)
    tile = max(128, (tile // 128) * 128)
    return int(tile)


def _bclassifier_kernel(feats_ref, wq_ref, bq_ref, qmax_ref,
                        s_out_ref, m_out_ref, l_out_ref, bacc_out_ref,
                        m_sc, l_sc, bacc_sc,
                        *, n_valid, tile_n, tiles_per_split, scale, masked):
    split = pl.program_id(0)
    t = pl.program_id(1)
    last = pl.num_programs(1) - 1

    @pl.when(t == 0)
    def _init():
        m_sc[...] = jnp.full_like(m_sc, -jnp.inf)
        l_sc[...] = jnp.zeros_like(l_sc)
        bacc_sc[...] = jnp.zeros_like(bacc_sc)

    feats = feats_ref[...]                               # [tile_n, D] (compute dtype)

    # Q_tile = q(feats): f32 MXU accumulation, then cast to compute dtype so the
    # logits matmul stays on the native low-precision MXU path and the largest
    # per-tile VMEM intermediate is half-width.
    q_tile = (jnp.dot(feats, wq_ref[...], preferred_element_type=jnp.float32)
              + bq_ref[...]).astype(feats.dtype)          # [tile_n, QDIM]

    # Lane-dense logits: s[k, n] = (q_max[k, :] . Q[n, :]) / sqrt(128).
    # TODO(synk): confirm with pl.lower_as_mlir on hardware that this NT
    # dot_general does not materialize an explicit q_tile transpose per step.
    s = lax.dot_general(qmax_ref[...], q_tile, (((1,), (1,)), ((), ())),
                        preferred_element_type=jnp.float32) * jnp.float32(scale)

    if masked:
        # Padded instance columns must not affect the softmax.
        col = ((split * tiles_per_split + t) * tile_n
               + lax.broadcasted_iota(jnp.int32, s.shape, 1))
        s = jnp.where(col < n_valid, s, -jnp.inf)

    # Raw scaled logits out (lane-dense [K, tile_n] slab); normalized outside.
    s_out_ref[...] = s.astype(s_out_ref.dtype)

    # Online softmax over the instance (lane) axis, all stats in f32.
    m_prev = m_sc[...]
    m_new = jnp.maximum(m_prev, jnp.max(s, axis=1, keepdims=True))      # [K, 1]
    # NaN guard for a fully-masked tile (possible when a core's range is all
    # padding): shift by 0 so exp(-inf - 0) == 0 everywhere.
    m_safe = jnp.where(m_new == -jnp.inf, jnp.float32(0.0), m_new)
    alpha = jnp.exp(m_prev - m_safe)                                    # [K, 1]
    p = jnp.exp(s - m_safe)                                             # [K, tile_n]
    l_sc[...] = alpha * l_sc[...] + jnp.sum(p, axis=1, keepdims=True)
    bacc_sc[...] = alpha * bacc_sc[...] + jnp.dot(
        p.astype(feats.dtype), feats, preferred_element_type=jnp.float32)  # [K, D]
    m_sc[...] = m_new

    @pl.when(t == last)
    def _finalize():
        m_out_ref[...] = m_sc[...][None]          # [1, K, 1] per-split partials
        l_out_ref[...] = l_sc[...][None]
        bacc_out_ref[...] = bacc_sc[...][None]    # [1, K, D]


def bclassifier_forward(feats, c, wq, bq, wfcc, bfcc, *, tile_n=None,
                        num_splits=None, compute_dtype=jnp.bfloat16,
                        slab_dtype=None):
    """feats: [N, D] f32, c: [N, K] f32, wq: [D, 128] (pre-transposed Linear weight)."""
    N, D = feats.shape
    K = c.shape[1]
    slab_dtype = compute_dtype if slab_dtype is None else slab_dtype
    cb = jnp.dtype(compute_dtype).itemsize
    sb = jnp.dtype(slab_dtype).itemsize

    budget, vmem_cap, n_cores = _device_defaults()
    if num_splits is None:
        num_splits = n_cores

    # m_indices[0, :] of torch.sort(c, 0, descending=True): per-class first max.
    # (jnp.argmax picks the first max on ties; torch's sort tie order is
    # unspecified -- benign difference.)
    idx = jnp.argmax(c, axis=0)
    m_feats = jnp.take(feats, idx, axis=0)                     # [K, D]
    q_max = (m_feats @ wq + bq).astype(compute_dtype)          # [K, 128] (tiny, XLA)

    feats_c = feats.astype(compute_dtype)
    wq_c = wq.astype(compute_dtype)
    bq_f32 = bq.astype(jnp.float32)

    # --- tiling over N (always a multiple of 128 lanes for lane-dense stores) ---
    if tile_n is None:
        tile_n_eff = _pick_tile_n(D, K, cb, sb, budget)
        tile_n_eff = min(tile_n_eff, _round_up(_cdiv(N, num_splits), 128))
    else:
        tile_n_eff = _round_up(int(tile_n), 128)

    total_tiles = _cdiv(N, tile_n_eff)
    tiles_per_split = _cdiv(total_tiles, num_splits)
    n_pad = num_splits * tiles_per_split * tile_n_eff
    if n_pad != N:
        feats_c = jnp.pad(feats_c, ((0, n_pad - N), (0, 0)))

    kernel = functools.partial(
        _bclassifier_kernel, n_valid=N, tile_n=tile_n_eff,
        tiles_per_split=tiles_per_split, scale=1.0 / math.sqrt(QDIM),
        masked=(n_pad != N))

    # vmem limit from actual tile bytes (not hardcoded), capped per generation.
    tile_vmem = (2 * tile_n_eff * D * cb + 2 * K * tile_n_eff * sb
                 + tile_n_eff * QDIM * (4 + cb) + 4 * K * tile_n_eff * 4)
    resident_vmem = (D * QDIM + K * QDIM) * cb + QDIM * 4 + 2 * K * (D + 2) * 4
    vmem_limit = int(min(vmem_cap, max(32 * 1024 * 1024,
                                       tile_vmem + resident_vmem + (8 << 20))))

    flops = (2 * n_pad * D * QDIM      # q projection
             + 2 * n_pad * QDIM * K    # logits
             + 2 * n_pad * K * D)      # B accumulation
    bytes_accessed = (n_pad * D * cb                       # feats stream (dominant)
                      + K * n_pad * sb                     # logits slab
                      + (D * QDIM + K * QDIM) * cb + QDIM * 4
                      + num_splits * K * (D + 2) * 4)
    cost = pl.CostEstimate(flops=int(flops), transcendentals=int(n_pad * K),
                           bytes_accessed=int(bytes_accessed))

    S, m_parts, l_parts, bacc_parts = pl.pallas_call(
        kernel,
        out_shape=(
            jax.ShapeDtypeStruct((K, n_pad), slab_dtype),            # raw scaled logits
            jax.ShapeDtypeStruct((num_splits, K, 1), jnp.float32),   # per-split m
            jax.ShapeDtypeStruct((num_splits, K, 1), jnp.float32),   # per-split l
            jax.ShapeDtypeStruct((num_splits, K, D), jnp.float32),   # per-split B_acc
        ),
        grid=(num_splits, tiles_per_split),
        in_specs=[
            pl.BlockSpec((tile_n_eff, D),
                         lambda s, t: (s * tiles_per_split + t, 0)),   # feats: streamed
            pl.BlockSpec((D, QDIM), lambda s, t: (0, 0)),              # wq: resident
            pl.BlockSpec((1, QDIM), lambda s, t: (0, 0)),              # bq: resident
            pl.BlockSpec((K, QDIM), lambda s, t: (0, 0)),              # q_max: resident
        ],
        out_specs=(
            pl.BlockSpec((K, tile_n_eff),
                         lambda s, t: (0, s * tiles_per_split + t)),   # logits slab
            pl.BlockSpec((1, K, 1), lambda s, t: (s, 0, 0)),
            pl.BlockSpec((1, K, 1), lambda s, t: (s, 0, 0)),
            pl.BlockSpec((1, K, D), lambda s, t: (s, 0, 0)),
        ),
        scratch_shapes=[
            pltpu.VMEM((K, 1), jnp.float32),   # running max m
            pltpu.VMEM((K, 1), jnp.float32),   # running denom l
            pltpu.VMEM((K, D), jnp.float32),   # B accumulator
        ],
        compiler_params=pltpu.CompilerParams(
            dimension_semantics=("parallel", "arbitrary"),
            vmem_limit_bytes=vmem_limit),
        cost_estimate=cost,
    )(feats_c, wq_c, bq_f32, q_max)

    # --- tiny XLA glue: log-sum-exp combine of per-core partials, A, Conv1d ---
    m_g = jnp.max(m_parts, axis=0)                            # [K, 1]
    m_g = jnp.where(jnp.isfinite(m_g), m_g, 0.0)              # guard all-padding splits
    w = jnp.exp(m_parts - m_g)                                # [S, K, 1]
    l_g = jnp.sum(w * l_parts, axis=0)                        # [K, 1]
    B = jnp.sum(w * bacc_parts, axis=0) / l_g                 # [K, D]  (V == Identity)

    S_logits = S[:, :N].astype(jnp.float32)                   # [K, N]
    A = (jnp.exp(S_logits - m_g) * (1.0 / l_g)).T             # [N, K]

    # Conv1d(K, K, kernel_size=D) over a length-D signal == full contraction.
    C = (wfcc.reshape(K, K * D) @ B.reshape(K * D) + bfcc[0])[None, :]   # [1, K]
    return C, A, B[None, :, :]


def _reference(feats, c, wq, bq, wfcc, bfcc):
    """Pure-JAX reference mirroring the PyTorch forward."""
    V = feats
    Q = feats @ wq + bq
    idx = jnp.argmax(c, axis=0)                      # m_indices[0, :]
    m_feats = feats[idx]
    q_max = m_feats @ wq + bq
    A = jax.nn.softmax((Q @ q_max.T) / jnp.sqrt(jnp.float32(QDIM)), axis=0)
    B = A.T @ V
    C = jnp.sum(wfcc * B[None, :, :], axis=(1, 2)) + bfcc[0]
    return C[None, :], A, B[None, :, :]


if __name__ == "__main__":
    # Small, module-consistent shapes: N instances, input_size D, output_class K.
    N, D, K = 250, 64, 4

    key = jax.random.PRNGKey(0)
    k_feats, k_c, k_wq, k_bq, k_wf, k_bf = jax.random.split(key, 6)

    feats = jax.random.normal(k_feats, (N, D), dtype=jnp.float32)
    c = jax.random.normal(k_c, (N, K), dtype=jnp.float32)

    # Deterministic synthetic parameters (shapes from BClassifier.__init__).
    wq_linear = jax.random.normal(k_wq, (QDIM, D), dtype=jnp.float32) * 0.05   # nn.Linear weight [128, D]
    bq = jax.random.normal(k_bq, (1, QDIM), dtype=jnp.float32) * 0.05          # nn.Linear bias
    wq = wq_linear.T                                                           # [D, 128] pre-transposed
    wfcc = jax.random.normal(k_wf, (K, K, D), dtype=jnp.float32) * 0.05        # Conv1d weight [K, K, D]
    bfcc = jax.random.normal(k_bf, (1, K), dtype=jnp.float32) * 0.05           # Conv1d bias

    C_ref, A_ref, B_ref = _reference(feats, c, wq, bq, wfcc, bfcc)

    # 1) f32 path, forced multi-tile + 2-way core split: exercises the ragged
    #    last tile masking and the cross-split log-sum-exp combine.
    C1, A1, B1 = bclassifier_forward(feats, c, wq, bq, wfcc, bfcc,
                                     tile_n=128, num_splits=2,
                                     compute_dtype=jnp.float32)
    jax.block_until_ready((C1, A1, B1))
    assert jnp.allclose(C1, C_ref, rtol=1e-4, atol=1e-4)
    assert jnp.allclose(A1, A_ref, rtol=1e-4, atol=1e-4)
    assert jnp.allclose(B1, B_ref, rtol=1e-4, atol=1e-4)

    # 2) f32 path where the second split's range is entirely padding
    #    (exercises the fully-masked-tile NaN guard and zero-weight combine).
    C2, A2, B2 = bclassifier_forward(feats, c, wq, bq, wfcc, bfcc,
                                     tile_n=256, num_splits=2,
                                     compute_dtype=jnp.float32)
    jax.block_until_ready((C2, A2, B2))
    assert jnp.allclose(C2, C_ref, rtol=1e-4, atol=1e-4)
    assert jnp.allclose(A2, A_ref, rtol=1e-4, atol=1e-4)
    assert jnp.allclose(B2, B_ref, rtol=1e-4, atol=1e-4)

    # 3) bf16 streaming matmuls + bf16 logits slab, device-derived tile_n /
    #    core split; f32 accumulators; relaxed tolerance vs f32 reference.
    C3, A3, B3 = bclassifier_forward(feats, c, wq, bq, wfcc, bfcc,
                                     compute_dtype=jnp.bfloat16)
    jax.block_until_ready((C3, A3, B3))
    assert jnp.allclose(C3, C_ref, rtol=2e-2, atol=2e-2)
    assert jnp.allclose(A3, A_ref, rtol=2e-2, atol=2e-2)
    assert jnp.allclose(B3, B_ref, rtol=2e-2, atol=2e-2)

    print("KERNEL_OK")
</pallas_src>

<mosaic_0001>
module attributes {stable_mosaic.version = 11 : i64} {
  func.func @_bclassifier_kernel(%arg0: i32, %arg1: i32, %arg2: memref<128x64xf32, #tpu.memory_space<vmem>>, %arg3: memref<64x128xf32, #tpu.memory_space<vmem>>, %arg4: memref<1x128xf32, #tpu.memory_space<vmem>>, %arg5: memref<4x128xf32, #tpu.memory_space<vmem>>, %arg6: memref<4x128xf32, #tpu.memory_space<vmem>>, %arg7: memref<1x4x1xf32, #tpu.memory_space<vmem>>, %arg8: memref<1x4x1xf32, #tpu.memory_space<vmem>>, %arg9: memref<1x4x64xf32, #tpu.memory_space<vmem>>, %arg10: memref<4x1xf32, #tpu.memory_space<vmem>>, %arg11: memref<4x1xf32, #tpu.memory_space<vmem>>, %arg12: memref<4x64xf32, #tpu.memory_space<vmem>>) attributes {dimension_semantics = [#tpu.dimension_semantics<parallel>, #tpu.dimension_semantics<arbitrary>], iteration_bounds = array<i64: 2, 1>, scalar_prefetch = 0 : i64, scratch_operands = 3 : i64, tpu.core_type = #tpu.core_type<tc>, window_params = [{transform_indices = @transform_0, window_bounds = array<i64: 128, 64>}, {pipeline_mode = #tpu.pipeline_mode<synchronous>, transform_indices = @transform_1, window_bounds = array<i64: 64, 128>}, {pipeline_mode = #tpu.pipeline_mode<synchronous>, transform_indices = @transform_2, window_bounds = array<i64: 1, 128>}, {pipeline_mode = #tpu.pipeline_mode<synchronous>, transform_indices = @transform_3, window_bounds = array<i64: 4, 128>}, {transform_indices = @transform_4, window_bounds = array<i64: 4, 128>}, {transform_indices = @transform_5, window_bounds = array<i64: 1, 4, 1>}, {transform_indices = @transform_6, window_bounds = array<i64: 1, 4, 1>}, {transform_indices = @transform_7, window_bounds = array<i64: 1, 4, 64>}]} {
    %c0_i32 = arith.constant 0 : i32
    %0 = arith.cmpi eq, %arg1, %c0_i32 : i32
    %1 = arith.extui %0 : i1 to i32
    %c0_i32_0 = arith.constant 0 : i32
    %2 = arith.cmpi ne, %1, %c0_i32_0 : i32
    scf.if %2 {
      %cst_32 = arith.constant 0xFF800000 : f32
      %53 = vector.broadcast %cst_32 : f32 to vector<4x1xf32>
      %c0_33 = arith.constant 0 : index
      %c0_34 = arith.constant 0 : index
      %54 = vector.load %arg10[%c0_33, %c0_34] : memref<4x1xf32, #tpu.memory_space<vmem>>, vector<4x1xf32>
      tpu.vector_store %arg10[%c0_33, %c0_34], %53 {strides = array<i32>} : memref<4x1xf32, #tpu.memory_space<vmem>>, vector<4x1xf32>,
      %cst_35 = arith.constant 0.000000e+00 : f32
      %55 = vector.broadcast %cst_35 : f32 to vector<4x1xf32>
      %c0_36 = arith.constant 0 : index
      %c0_37 = arith.constant 0 : index
      %56 = vector.load %arg11[%c0_36, %c0_37] : memref<4x1xf32, #tpu.memory_space<vmem>>, vector<4x1xf32>
      tpu.vector_store %arg11[%c0_36, %c0_37], %55 {strides = array<i32>} : memref<4x1xf32, #tpu.memory_space<vmem>>, vector<4x1xf32>,
      %cst_38 = arith.constant 0.000000e+00 : f32
      %57 = vector.broadcast %cst_38 : f32 to vector<4x64xf32>
      %c0_39 = arith.constant 0 : index
      %c0_40 = arith.constant 0 : index
      %58 = vector.load %arg12[%c0_39, %c0_40] : memref<4x64xf32, #tpu.memory_space<vmem>>, vector<4x64xf32>
      tpu.vector_store %arg12[%c0_39, %c0_40], %57 {strides = array<i32>} : memref<4x64xf32, #tpu.memory_space<vmem>>, vector<4x64xf32>,
    } else {
    }
    %c0 = arith.constant 0 : index
    %c0_1 = arith.constant 0 : index
    %3 = vector.load %arg2[%c0, %c0_1] : memref<128x64xf32, #tpu.memory_space<vmem>>, vector<128x64xf32>
    %c0_2 = arith.constant 0 : index
    %c0_3 = arith.constant 0 : index
    %4 = vector.load %arg3[%c0_2, %c0_3] : memref<64x128xf32, #tpu.memory_space<vmem>>, vector<64x128xf32>
    %cst = arith.constant dense<0.000000e+00> : vector<128x128xf32>
    %5 = tpu.matmul %3, %4, %cst {dimension_numbers = #tpu.dot_dimension_numbers<[1], [0], [0], [1], [0, 0, 1, 1], [], []>} : vector<128x64xf32>, vector<64x128xf32>, vector<128x128xf32> -> vector<128x128xf32>
    %c0_4 = arith.constant 0 : index
    %c0_5 = arith.constant 0 : index
    %6 = vector.load %arg4[%c0_4, %c0_5] : memref<1x128xf32, #tpu.memory_space<vmem>>, vector<1x128xf32>
    %7 = vector.broadcast %6 : vector<1x128xf32> to vector<128x128xf32>
    %8 = arith.addf %5, %7 : vector<128x128xf32>
    %c0_6 = arith.constant 0 : index
    %c0_7 = arith.constant 0 : index
    %9 = vector.load %arg5[%c0_6, %c0_7] : memref<4x128xf32, #tpu.memory_space<vmem>>, vector<4x128xf32>
    %cst_8 = arith.constant dense<0.000000e+00> : vector<4x128xf32>
    %10 = tpu.matmul %9, %8, %cst_8 {dimension_numbers = #tpu.dot_dimension_numbers<[1], [1], [0], [0], [0, 0, 1, 0], [], []>} : vector<4x128xf32>, vector<128x128xf32>, vector<4x128xf32> -> vector<4x128xf32>
    %cst_9 = arith.constant 0.0883883461 : f32
    %11 = vector.broadcast %cst_9 : f32 to vector<4x128xf32>
    %12 = arith.mulf %10, %11 : vector<4x128xf32>
    %c1_i32 = arith.constant 1 : i32
    %13 = arith.muli %arg0, %c1_i32 : i32
    %14 = arith.addi %13, %arg1 : i32
    %c128_i32 = arith.constant 128 : i32
    %15 = arith.muli %14, %c128_i32 : i32
    %16 = tpu.iota {dimensions = array<i32: 1>} : vector<4x128xi32>
    %17 = vector.broadcast %15 : i32 to vector<4x128xi32>
    %18 = arith.addi %17, %16 : vector<4x128xi32>
    %c250_i32 = arith.constant 250 : i32
    %19 = vector.broadcast %c250_i32 : i32 to vector<4x128xi32>
    %20 = arith.cmpi slt, %18, %19 : vector<4x128xi32>
    %cst_10 = arith.constant 0xFF800000 : f32
    %21 = vector.broadcast %cst_10 : f32 to vector<4x128xf32>
    %22 = arith.select %20, %12, %21 : vector<4x128xi1>, vector<4x128xf32>
    %c0_11 = arith.constant 0 : index
    %c0_12 = arith.constant 0 : index
    %23 = vector.load %arg6[%c0_11, %c0_12] : memref<4x128xf32, #tpu.memory_space<vmem>>, vector<4x128xf32>
    tpu.vector_store %arg6[%c0_11, %c0_12], %22 {strides = array<i32>} : memref<4x128xf32, #tpu.memory_space<vmem>>, vector<4x128xf32>,
    %c0_13 = arith.constant 0 : index
    %c0_14 = arith.constant 0 : index
    %24 = vector.load %arg10[%c0_13, %c0_14] : memref<4x1xf32, #tpu.memory_space<vmem>>, vector<4x1xf32>
    %cst_15 = arith.constant dense<0xFF800000> : vector<4xf32>
    %25 = vector.multi_reduction <maximumf>, %22, %cst_15 [1] : vector<4x128xf32> to vector<4xf32>
    %26 = vector.shape_cast %25 : vector<4xf32> to vector<4x1xf32>
    %27 = arith.maximumf %24, %26 : vector<4x1xf32>
    %cst_16 = arith.constant 0xFF800000 : f32
    %28 = vector.broadcast %cst_16 : f32 to vector<4x1xf32>
    %29 = arith.cmpf oeq, %27, %28 : vector<4x1xf32>
    %cst_17 = arith.constant 0.000000e+00 : f32
    %30 = vector.broadcast %cst_17 : f32 to vector<4x1xf32>
    %31 = arith.select %29, %30, %27 : vector<4x1xi1>, vector<4x1xf32>
    %32 = arith.subf %24, %31 : vector<4x1xf32>
    %33 = math.exp %32 : vector<4x1xf32>
    %34 = vector.broadcast %31 : vector<4x1xf32> to vector<4x128xf32>
    %35 = arith.subf %22, %34 : vector<4x128xf32>
    %36 = math.exp %35 : vector<4x128xf32>
    %c0_18 = arith.constant 0 : index
    %c0_19 = arith.constant 0 : index
    %37 = vector.load %arg11[%c0_18, %c0_19] : memref<4x1xf32, #tpu.memory_space<vmem>>, vector<4x1xf32>
    %38 = arith.mulf %33, %37 : vector<4x1xf32>
    %cst_20 = arith.constant dense<0.000000e+00> : vector<4xf32>
    %39 = vector.multi_reduction <add>, %36, %cst_20 [1] : vector<4x128xf32> to vector<4xf32>
    %40 = vector.shape_cast %39 : vector<4xf32> to vector<4x1xf32>
    %41 = arith.addf %38, %40 : vector<4x1xf32>
    %c0_21 = arith.constant 0 : index
    %c0_22 = arith.constant 0 : index
    %42 = vector.load %arg11[%c0_21, %c0_22] : memref<4x1xf32, #tpu.memory_space<vmem>>, vector<4x1xf32>
    tpu.vector_store %arg11[%c0_21, %c0_22], %41 {strides = array<i32>} : memref<4x1xf32, #tpu.memory_space<vmem>>, vector<4x1xf32>,
    %c0_23 = arith.constant 0 : index
    %c0_24 = arith.constant 0 : index
    %43 = vector.load %arg12[%c0_23, %c0_24] : memref<4x64xf32, #tpu.memory_space<vmem>>, vector<4x64xf32>
    %44 = vector.broadcast %33 : vector<4x1xf32> to vector<4x64xf32>
    %45 = arith.mulf %44, %43 : vector<4x64xf32>
    %cst_25 = arith.constant dense<0.000000e+00> : vector<4x64xf32>
    %46 = tpu.matmul %36, %3, %cst_25 {dimension_numbers = #tpu.dot_dimension_numbers<[1], [0], [0], [1], [0, 0, 1, 1], [], []>} : vector<4x128xf32>, vector<128x64xf32>, vector<4x64xf32> -> vector<4x64xf32>
    %47 = arith.addf %45, %46 : vector<4x64xf32>
    %c0_26 = arith.constant 0 : index
    %c0_27 = arith.constant 0 : index
    %48 = vector.load %arg12[%c0_26, %c0_27] : memref<4x64xf32, #tpu.memory_space<vmem>>, vector<4x64xf32>
    tpu.vector_store %arg12[%c0_26, %c0_27], %47 {strides = array<i32>} : memref<4x64xf32, #tpu.memory_space<vmem>>, vector<4x64xf32>,
    %c0_28 = arith.constant 0 : index
    %c0_29 = arith.constant 0 : index
    %49 = vector.load %arg10[%c0_28, %c0_29] : memref<4x1xf32, #tpu.memory_space<vmem>>, vector<4x1xf32>
    tpu.vector_store %arg10[%c0_28, %c0_29], %27 {strides = array<i32>} : memref<4x1xf32, #tpu.memory_space<vmem>>, vector<4x1xf32>,
    %c0_i32_30 = arith.constant 0 : i32
    %50 = arith.cmpi eq, %arg1, %c0_i32_30 : i32
    %51 = arith.extui %50 : i1 to i32
    %c0_i32_31 = arith.constant 0 : i32
    %52 = arith.cmpi ne, %51, %c0_i32_31 : i32
    scf.if %52 {
      %c0_32 = arith.constant 0 : index
      %c0_33 = arith.constant 0 : index
      %53 = vector.load %arg10[%c0_32, %c0_33] : memref<4x1xf32, #tpu.memory_space<vmem>>, vector<4x1xf32>
      %54 = vector.shape_cast %53 : vector<4x1xf32> to vector<1x4x1xf32>
      %c0_34 = arith.constant 0 : index
      %c0_35 = arith.constant 0 : index
      %c0_36 = arith.constant 0 : index
      %55 = vector.load %arg7[%c0_34, %c0_35, %c0_36] : memref<1x4x1xf32, #tpu.memory_space<vmem>>, vector<1x4x1xf32>
      tpu.vector_store %arg7[%c0_34, %c0_35, %c0_36], %54 {strides = array<i32>} : memref<1x4x1xf32, #tpu.memory_space<vmem>>, vector<1x4x1xf32>,
      %c0_37 = arith.constant 0 : index
      %c0_38 = arith.constant 0 : index
      %56 = vector.load %arg11[%c0_37, %c0_38] : memref<4x1xf32, #tpu.memory_space<vmem>>, vector<4x1xf32>
      %57 = vector.shape_cast %56 : vector<4x1xf32> to vector<1x4x1xf32>
      %c0_39 = arith.constant 0 : index
      %c0_40 = arith.constant 0 : index
      %c0_41 = arith.constant 0 : index
      %58 = vector.load %arg8[%c0_39, %c0_40, %c0_41] : memref<1x4x1xf32, #tpu.memory_space<vmem>>, vector<1x4x1xf32>
      tpu.vector_store %arg8[%c0_39, %c0_40, %c0_41], %57 {strides = array<i32>} : memref<1x4x1xf32, #tpu.memory_space<vmem>>, vector<1x4x1xf32>,
      %c0_42 = arith.constant 0 : index
      %c0_43 = arith.constant 0 : index
      %59 = vector.load %arg12[%c0_42, %c0_43] : memref<4x64xf32, #tpu.memory_space<vmem>>, vector<4x64xf32>
      %60 = vector.shape_cast %59 : vector<4x64xf32> to vector<1x4x64xf32>
      %c0_44 = arith.constant 0 : index
      %c0_45 = arith.constant 0 : index
      %c0_46 = arith.constant 0 : index
      %61 = vector.load %arg9[%c0_44, %c0_45, %c0_46] : memref<1x4x64xf32, #tpu.memory_space<vmem>>, vector<1x4x64xf32>
      tpu.vector_store %arg9[%c0_44, %c0_45, %c0_46], %60 {strides = array<i32>} : memref<1x4x64xf32, #tpu.memory_space<vmem>>, vector<1x4x64xf32>,
    } else {
    }
    return
  }
  func.func @transform_0(%arg0: i32, %arg1: i32) -> (i32, i32) {
    %c1_i32 = arith.constant 1 : i32
    %0 = arith.muli %arg0, %c1_i32 : i32
    %1 = arith.addi %0, %arg1 : i32
    %c0_i32 = arith.constant 0 : i32
    %c0_i32_0 = arith.constant 0 : i32
    return %1, %c0_i32 : i32, i32
  }
  func.func @transform_1(%arg0: i32, %arg1: i32) -> (i32, i32) {
    %c0_i32 = arith.constant 0 : i32
    %c0_i32_0 = arith.constant 0 : i32
    %c0_i32_1 = arith.constant 0 : i32
    return %c0_i32, %c0_i32_0 : i32, i32
  }
  func.func @transform_2(%arg0: i32, %arg1: i32) -> (i32, i32) {
    %c0_i32 = arith.constant 0 : i32
    %c0_i32_0 = arith.constant 0 : i32
    %c0_i32_1 = arith.constant 0 : i32
    return %c0_i32, %c0_i32_0 : i32, i32
  }
  func.func @transform_3(%arg0: i32, %arg1: i32) -> (i32, i32) {
    %c0_i32 = arith.constant 0 : i32
    %c0_i32_0 = arith.constant 0 : i32
    %c0_i32_1 = arith.constant 0 : i32
    return %c0_i32, %c0_i32_0 : i32, i32
  }
  func.func @transform_4(%arg0: i32, %arg1: i32) -> (i32, i32) {
    %c1_i32 = arith.constant 1 : i32
    %0 = arith.muli %arg0, %c1_i32 : i32
    %1 = arith.addi %0, %arg1 : i32
    %c0_i32 = arith.constant 0 : i32
    %c0_i32_0 = arith.constant 0 : i32
    return %c0_i32, %1 : i32, i32
  }
  func.func @transform_5(%arg0: i32, %arg1: i32) -> (i32, i32, i32) {
    %c0_i32 = arith.constant 0 : i32
    %c0_i32_0 = arith.constant 0 : i32
    %c0_i32_1 = arith.constant 0 : i32
    return %arg0, %c0_i32, %c0_i32_0 : i32, i32, i32
  }
  func.func @transform_6(%arg0: i32, %arg1: i32) -> (i32, i32, i32) {
    %c0_i32 = arith.constant 0 : i32
    %c0_i32_0 = arith.constant 0 : i32
    %c0_i32_1 = arith.constant 0 : i32
    return %arg0, %c0_i32, %c0_i32_0 : i32, i32, i32
  }
  func.func @transform_7(%arg0: i32, %arg1: i32) -> (i32, i32, i32) {
    %c0_i32 = arith.constant 0 : i32
    %c0_i32_0 = arith.constant 0 : i32
    %c0_i32_1 = arith.constant 0 : i32
    return %arg0, %c0_i32, %c0_i32_0 : i32, i32, i32
  }
}

</mosaic_0001>

<bundles_post_ra>
// kernel: tpu_custom_call.1
= control target key start
LH: loop header
LB: loop body
LE: loop exit
PB: predicated region body
PF: predicated region fallthrough
CT: control target
= control target key end

     0   :  { %13 = vsyncpa [#allocation6], 0  ;;  %s1699_s0 = inlined_call_operand.vmem [shape: f32[256,64], index: 0, kind: input, shape index: {}]   ;;  %s1700_s1 = inlined_call_operand.vmem [shape: f32[64,128], index: 1, kind: input, shape index: {}]   ;;  %s1701_s2 = inlined_call_operand.vmem [shape: f32[1,128], index: 2, kind: input, shape index: {}]   ;;  %s1702_s3 = inlined_call_operand.vmem [shape: f32[4,128], index: 3, kind: input, shape index: {}]   ;;  %s1703_s4 = inlined_call_operand.hbm [shape: f32[4,256], index: 4, kind: output, shape index: {0}]   ;;  %s1704_s5 = inlined_call_operand.vmem [shape: f32[2,4,1], index: 5, kind: output, shape index: {1}]   ;;  %s1705_s6 = inlined_call_operand.vmem [shape: f32[2,4,1], index: 6, kind: output, shape index: {2}]   ;;  %s1706_s7 = inlined_call_operand.hbm [shape: f32[2,4,64], index: 7, kind: output, shape index: {3}]  }
   0x1   :  { %15 = vsyncpa [#allocation6 + $0x1], 0 }
   0x2   :  { %16 = vsyncpa [#allocation8], 0 }
   0x3   :  { %18 = vsyncpa [#allocation8 + $0x1], 0  ;;  %s1456_s24 = smov 0   ;;  %s1458_s25 = smov 0  }
   0x4   :  { %s1460_s26 = smov 0   ;;  %s1462_s27 = smov 0  }
   0x5   :  { %s1464_s28 = smov 0   ;;  %s1466_s29 = smov 0  }
   0x6 LB: > { %s959_s30 = sadd.s32 4294967295, %s1407_s29   ;;  %s960_s8 = sadd.s32 4294967294, %s1407_s29   ;;  %s1407_s29 = sphi %s1466_s29, %s24_s29   ;;  %s1403_s28 = sphi %s1464_s28, %s1719_s28   ;;  %s1399_s27 = sphi %s1462_s27, %s1718_s27   ;;  %s1395_s26 = sphi %s1460_s26, %s1717_s26   ;;  %s1391_s25 = sphi %s1458_s25, %s1716_s25   ;;  %s1387_s24 = sphi %s1456_s24, %s1715_s24  }
   0x7   : > { %s36_s9 = sadd.s32 1, %s1403_s28  ;;  %s136_s10 = sadd.s32 1, %s1395_s26 }
   0x8   : > { %p38_p0 = scmp.ge.s32.totalorder %s36_s9, 2  ;;  %p146_p1 = scmp.ne.s32.totalorder %s1395_s26, %s1391_s25 }
   0x9   : > { %p147_p2 = scmp.eq.s32.totalorder %s959_s30, 1  ;;  %p152_p3 = scmp.ne.s32.totalorder %s1391_s25, %s1387_s24 }
   0xa   : > { %s1721_s9 = smov (%p38_p0, %s36_s9), 0  ;;  %p153_p5 = scmp.eq.s32.totalorder %s960_s8, 1 }
   0xb   : > { %p1496_p4 = por %p147_p2, %p146_p1  ;;  %s133_s12 = ssub.s32 %s1403_s28, %s1721_s9 }
   0xc   : > { %p963_p6 = scmp.ge.s32.totalorder %s1407_s29, 1  ;;  %p134_p7 = scmp.eq.s32.totalorder %s133_s12, 0 }
   0xd   : > { %p1503_p8 = por %p153_p5, %p152_p3  ;;  %p269_p9 = scmp.lt.s32.totalorder %s1407_s29, 3 }
   0xe   : > { %s1509_s14 = scalar_select %p134_p7, %s1395_s26, %s136_s10  }
   0xf   : > { %p270_p10 = pnand %p963_p6, %p269_p9 }
  0x10   : > { %v357_v0 = vld [vmem:[%s1700_s1] sm:$0xff] (!%p270_p10)  ;;  %v358_v1 = vld [vmem:[%s1700_s1 + $0x8] sm:$0xff] (!%p270_p10)  ;;  %v359_v2 = vld [vmem:[%s1700_s1 + $0x10] sm:$0xff] (!%p270_p10)  ;;  %s966_s21 = sshll.u32 (!%p270_p10), %s1399_s27, 4  ;;  %vm372_vm0 = vcmask (!%p270_p10), 523264   ;;  %v1409_v36 = vmov (!%p270_p10), 0.0|0.0  }
  0x11   : > { %273 = sbr.rel (%p270_p10) target bundleno = 1056 (0x420), region = 36  ;;  %v1162_v3 = vpack.c.bf16 (!%p270_p10), %v358_v1, %v357_v0  ;;  %v360_v4 = vld [vmem:[%s1700_s1 + $0x18] sm:$0xff] (!%p270_p10)  ;;  %p317_p11 = scmp.lt.s32.totalorder (!%p270_p10), %s966_s21, 31  ;;  %v361_v6 = vld [vmem:[%s1700_s1 + $0x20] sm:$0xff] (!%p270_p10)  ;;  %v362_v7 = vld [vmem:[%s1700_s1 + $0x28] sm:$0xff] (!%p270_p10)  ;;  %1178 = vmatprep.subr.bf16.mxu1 (!%p270_p10), %v1409_v36  ;;  %vm336_vm1 = vcmask (!%p270_p10), 3072  }
  0x12   : > { %v1166_v5 = vpack.c.bf16 (!%p270_p10), %v360_v4, %v359_v2  ;;  %v1170_v8 = vpack.c.bf16 (!%p270_p10), %v362_v7, %v361_v6  ;;  %v363_v9 = vld [vmem:[%s1700_s1 + $0x30] sm:$0xff] (!%p270_p10)  ;;  %v364_v10 = vld [vmem:[%s1700_s1 + $0x38] sm:$0xff] (!%p270_p10)  ;;  %v1410_v37 = vmov (!%p270_p10), 0.0   ;;  %vm1411_vm2 = vmmov (!%p270_p10), 0   ;;  %v970_v38 = vld [vmem:[%s1701_s2] ss:$0 sm:$0xff] (!%p270_p10) }
  0x13   : > { %1163 = vmatprep.subr.bf16.mxu0 (!%p270_p10), %v1162_v3  ;;  %v1174_v18 = vpack.c.bf16 (!%p270_p10), %v364_v10, %v363_v9  ;;  %338 = vst.msk [vmem:[#allocation3] sm:$0xf] (!%p270_p10), %vm336_vm1, %v1410_v37  ;;  %1124 = vmatprep.mubr.msk.f32.mxu1 (!%p270_p10), %vm1411_vm2, %v1410_v37  ;;  %s987_s12 = sshll.u32 (!%p270_p10), %s1399_s27, 7  ;;  %vm648_vm4 = vcmask (!%p270_p10), 1043456   ;;  %p324_p12 = scmp.lt.s32.totalorder (!%p270_p10), %s1399_s27, 1  ;;  %vm339_vm6 = vcmask (!%p270_p10), 519168  }
  0x14   : > { %1165 = vmatpush3.bf16.msra.mxu0 (!%p270_p10), %v1162_v3  ;;  %340 = vst.msk [vmem:[#allocation4] sm:$0xf] (!%p270_p10), %vm339_vm6, %v1410_v37 }
  0x15   : > { %1167 = vmatprep.subr.bf16.mxu0 (!%p270_p10), %v1166_v5 }
  0x18   : > { %s1723_s21 = smov (!%p317_p11, %s966_s21), 31  ;;  %1169 = vmatpush3.bf16.msra.mxu0 %v1166_v5 }
  0x19   : > { %s967_s15 = sshll.u32 %s1723_s21, 3  ;;  %1171 = vmatprep.subr.bf16.mxu0 %v1170_v8  ;;  %s1709_s21 = sshll.u32 %s1399_s27, 6 }
  0x1a   : > { %s320_s23 = scalar_lea.vmem %s1699_s0, %s967_s15  ;;  %s1584_s15 = sand.u32 1, %s1391_s25  }
  0x1b   : > { %v341_v11 = vld [vmem:[%s320_s23] sm:$0xff]  ;;  %v342_v12 = vld [vmem:[%s320_s23 + $0x8] sm:$0xff]  ;;  %v343_v13 = vld [vmem:[%s320_s23 + $0x10] sm:$0xff]  ;;  %s1707_s16 = sshll.u32 %s1584_s15, 2  ;;  %s1614_s10 = scalar_lea.hbm %s1703_s4, %s1709_s21 }
  0x1c   : > { %1068 = vmatprep.mubr.msk.f32.mxu0 %vm372_vm0, %v341_v11  ;;  %v1203_v14 = vpack.c.bf16 %v342_v12, %v341_v11  ;;  %v344_v15 = vld [vmem:[%s320_s23 + $0x18] sm:$0xff]  ;;  %v345_v16 = vld [vmem:[%s320_s23 + $0x20] sm:$0xff]  ;;  %v346_v17 = vld [vmem:[%s320_s23 + $0x28] sm:$0xff]  ;;  %1173 = vmatpush3.bf16.msra.mxu0 %v1170_v8  ;;  %s1590_s17 = scalar_lea.vmem [#allocation5], %s1707_s16  ;;  %s765_s20 = scalar_lea.sflag [#allocation6], %s1584_s15 }
  0x1d   : > { %v1206_v19 = vpack.c.bf16 %v344_v15, %v343_v13  ;;  %v1209_v20 = vpack.c.bf16 %v346_v17, %v345_v16  ;;  %v347_v21 = vld [vmem:[%s320_s23 + $0x30] sm:$0xff]  ;;  %v348_v22 = vld [vmem:[%s320_s23 + $0x38] sm:$0xff]  ;;  %v349_v23 = vld [vmem:[%s320_s23 + $0x40] sm:$0xff]  ;;  %1175 = vmatprep.subr.bf16.mxu0 %v1174_v18  ;;  %s1595_s18 = scalar_select %p324_p12, %s1399_s27, 1 }
  0x1e   : > { %v1212_v24 = vpack.c.bf16 %v348_v22, %v347_v21  ;;  %v350_v25 = vld [vmem:[%s320_s23 + $0x48] sm:$0xff]  ;;  %v351_v26 = vld [vmem:[%s320_s23 + $0x50] sm:$0xff]  ;;  %v352_v27 = vld [vmem:[%s320_s23 + $0x58] sm:$0xff] }
  0x1f   : > { %v1215_v28 = vpack.c.bf16 %v350_v25, %v349_v23  ;;  %v1218_v29 = vpack.c.bf16 %v352_v27, %v351_v26  ;;  %v353_v30 = vld [vmem:[%s320_s23 + $0x60] sm:$0xff]  ;;  %v354_v31 = vld [vmem:[%s320_s23 + $0x68] sm:$0xff]  ;;  %v355_v33 = vld [vmem:[%s320_s23 + $0x70] sm:$0xff]  ;;  %s1708_s19 = sshll.u32 %s1595_s18, 2 }
  0x20   : > { %v1221_v32 = vpack.c.bf16 %v354_v31, %v353_v30  ;;  %v356_v34 = vld [vmem:[%s320_s23 + $0x78] sm:$0xff]  ;;  %1177 = vmatpush3.bf16.msra.mxu0 %v1174_v18  ;;  %s327_s23 = scalar_lea.vmem %s1704_s5, %s1708_s19 }
  0x21   : > { %v1224_v35 = vpack.c.bf16 %v356_v34, %v355_v33  ;;  %1202 = vmatprep.subr.bf16.mxu0 %v1409_v36 }
  0x23   : > { %1069 = vmatmul.mubr.msk.f32.vlgmr.msra.gmra.mrb[0].mxu0 %vm372_vm0, %v342_v12 }
  0x24   : > { %1071 = vmatprep.mubr.msk.f32.mxu0 %vm372_vm0, %v343_v13  ;;  %1204 = vmatpush3.bf16.msra.mxu0 %v1203_v14 }
  0x25   : > { %1205 = vmatprep.subr.bf16.mxu0 %v1409_v36 }
  0x27   : > { %1072 = vmatmul.mubr.msk.f32.gmra.mrb[2].mxu0 %vm372_vm0, %v344_v15  ;;  %v566_v15 = vld [vmem:[%s1702_s3] sm:$0xf] }
  0x28   : > { %1074 = vmatprep.mubr.msk.f32.mxu0 %vm372_vm0, %v345_v16  ;;  %1207 = vmatpush3.bf16.msra.mxu0 %v1206_v19  ;;  %v1412_v16 = vmov -inf   ;;  %v642_v19 = vstv %s987_s12  ;;  %s792_s12 = sshll.u32 %s1590_s17, 4  ;;  %s793_s12 = int_to_ptr.vmem [resolvable:$true] %s792_s12 }
  0x29   : > { %1208 = vmatprep.subr.bf16.mxu0 %v1409_v36  ;;  %337 = vst.msk [vmem:[#allocation2] sm:$0xf] %vm336_vm1, %v1412_v16  ;;  %s1297_s22 = scalar_lea.vmem %s793_s12, 64 }
  0x2a   : > { %p1298_p13 = scmp.ne.s32.totalorder %s793_s12, %s1297_s22 }
  0x2b   : > { %1075 = vmatmul.mubr.msk.f32.gmra.mrb[4].mxu0 %vm372_vm0, %v346_v17  ;;  %v640_v17 = vlaneseq }
  0x2c   : > { %1077 = vmatprep.mubr.msk.f32.mxu0 %vm372_vm0, %v347_v21  ;;  %1210 = vmatpush3.bf16.msra.mxu0 %v1209_v20  ;;  %p1299_p0 = pnand %p1298_p13, %p1496_p4 }
  0x2d   : > { %1211 = vmatprep.subr.bf16.mxu0 %v1409_v36  ;;  %v641_v18 = vand.u32 127, %v640_v17 }
  0x2e   : > { %p1300_p1 = pneg %p1299_p0 }
  0x2f   : > { %1078 = vmatmul.mubr.msk.f32.gmra.mrb[6].mxu0 %vm372_vm0, %v348_v22  ;;  %v643_v20 = vadd.s32 %v642_v19, %v641_v18 }
  0x30   : > { %1080 = vmatprep.mubr.msk.f32.mxu0 %vm372_vm0, %v349_v23  ;;  %1213 = vmatpush3.bf16.msra.mxu0 %v1212_v24 }
  0x31   : > { %1214 = vmatprep.subr.bf16.mxu0 %v1409_v36  ;;  %vm644_vm3 = vcmp.lt.s32.totalorder %v643_v20, 250 }
  0x33   : > { %1081 = vmatmul.mubr.msk.f32.gmra.mrb[8].mxu0 %vm372_vm0, %v350_v25 }
  0x34   : > { %1083 = vmatprep.mubr.msk.f32.mxu0 %vm372_vm0, %v351_v26  ;;  %1216 = vmatpush3.bf16.msra.mxu0 %v1215_v28  ;;  %v1413_v26 = vmov 0  }
  0x35   : > { %1217 = vmatprep.subr.bf16.mxu0 %v1409_v36  ;;  %1291 = vset.pattern.permute.xlu0 %v1413_v26 }
  0x36   : > { %1292 = vset.pattern.permute.xlu1 %v1413_v26 }
  0x37   : > { %1084 = vmatmul.mubr.msk.f32.gmra.mrb[10].mxu0 %vm372_vm0, %v352_v27  ;;  %v647_v27 = vld [vmem:[#allocation2] sm:$0xf] }
  0x38   : > { %1086 = vmatprep.mubr.msk.f32.mxu0 %vm372_vm0, %v353_v30  ;;  %1219 = vmatpush3.bf16.msra.mxu0 %v1218_v29 }
  0x39   : > { %1220 = vmatprep.subr.bf16.mxu0 %v1409_v36 }
  0x3b   : > { %1087 = vmatmul.mubr.msk.f32.gmra.mrb[12].mxu0 %vm372_vm0, %v354_v31 }
  0x3c   : > { %1089 = vmatprep.mubr.msk.f32.mxu0 %vm372_vm0, %v355_v33  ;;  %1222 = vmatpush3.bf16.msra.mxu0 %v1221_v32 }
  0x3d   : > { %1223 = vmatprep.subr.bf16.mxu0 %v1409_v36 }
  0x3f   : > { %1090 = vmatmul.mubr.msk.f32.gmra.mrb[14].mxu0 %vm372_vm0, %v356_v34 }
  0x40   : > { %1225 = vmatpush3.bf16.msra.mxu0 %v1224_v35  ;;  %1159 = vmatprep.mubr.msk.f32.mxu0 %vm1411_vm2, %v1410_v37 }
  0xf6   : > { %v1070_v39 = vpop.f32.mrb[0].mxu0 }
  0xf7   : > { %v493_v40 = vadd.f32 %v1070_v39, %v970_v38  ;;  %v487_v41 = vpop.f32.mrb[1].mxu0 }
  0xf8   : > { %v488_v42 = vadd.f32 %v970_v38, %v487_v41 }
  0xfa   : > { %v1179_v43 = vpack.c.bf16 %v493_v40, %v488_v42  ;;  %v1073_v44 = vpop.f32.mrb[2].mxu0 }
  0xfb   : > { %v503_v45 = vadd.f32 %v1073_v44, %v970_v38  ;;  %v497_v46 = vpop.f32.mrb[3].mxu0 }
  0xfc   : > { %1180 = vmatpush3.bf16.xpose.msra.mxu1 %v1179_v43  ;;  %v498_v47 = vadd.f32 %v970_v38, %v497_v46 }
  0xfd   : > { %1181 = vmatprep.subr.bf16.mxu1 %v1409_v36 }
  0xfe   : > { %v1182_v48 = vpack.c.bf16 %v503_v45, %v498_v47  ;;  %v1076_v49 = vpop.f32.mrb[4].mxu0 }
  0xff   : > { %v513_v50 = vadd.f32 %v1076_v49, %v970_v38  ;;  %v507_v51 = vpop.f32.mrb[5].mxu0 }
 0x100   : > { %v508_v52 = vadd.f32 %v970_v38, %v507_v51 }
 0x102   : > { %v1185_v53 = vpack.c.bf16 %v513_v50, %v508_v52  ;;  %v1079_v54 = vpop.f32.mrb[6].mxu0 }
 0x103   : > { %v523_v55 = vadd.f32 %v1079_v54, %v970_v38  ;;  %v517_v56 = vpop.f32.mrb[7].mxu0 }
 0x104   : > { %1183 = vmatpush3.bf16.xpose.msra.mxu1 %v1182_v48  ;;  %v518_v57 = vadd.f32 %v970_v38, %v517_v56 }
 0x105   : > { %1184 = vmatprep.subr.bf16.mxu1 %v1409_v36 }
 0x106   : > { %v1188_v58 = vpack.c.bf16 %v523_v55, %v518_v57  ;;  %v1082_v59 = vpop.f32.mrb[8].mxu0 }
 0x107   : > { %v533_v60 = vadd.f32 %v1082_v59, %v970_v38  ;;  %v527_v61 = vpop.f32.mrb[9].mxu0 }
 0x108   : > { %v528_v62 = vadd.f32 %v970_v38, %v527_v61 }
 0x10a   : > { %v1191_v63 = vpack.c.bf16 %v533_v60, %v528_v62  ;;  %v1085_v0 = vpop.f32.mrb[10].mxu0 }
 0x10b   : > { %v543_v1 = vadd.f32 %v1085_v0, %v970_v38  ;;  %v537_v2 = vpop.f32.mrb[11].mxu0 }
 0x10c   : > { %1186 = vmatpush3.bf16.xpose.msra.mxu1 %v1185_v53  ;;  %v538_v3 = vadd.f32 %v970_v38, %v537_v2 }
 0x10d   : > { %1187 = vmatprep.subr.bf16.mxu1 %v1409_v36 }
 0x10e   : > { %v1194_v4 = vpack.c.bf16 %v543_v1, %v538_v3  ;;  %v1088_v5 = vpop.f32.mrb[12].mxu0 }
 0x10f   : > { %v553_v6 = vadd.f32 %v1088_v5, %v970_v38  ;;  %v547_v7 = vpop.f32.mrb[13].mxu0 }
 0x110   : > { %v548_v8 = vadd.f32 %v970_v38, %v547_v7 }
 0x112   : > { %v1197_v9 = vpack.c.bf16 %v553_v6, %v548_v8  ;;  %v1091_v10 = vpop.f32.mrb[14].mxu0 }
 0x113   : > { %v563_v11 = vadd.f32 %v1091_v10, %v970_v38  ;;  %v557_v12 = vpop.f32.mrb[15].mxu0 }
 0x114   : > { %1189 = vmatpush3.bf16.xpose.msra.mxu1 %v1188_v58  ;;  %v558_v13 = vadd.f32 %v970_v38, %v557_v12 }
 0x115   : > { %1190 = vmatprep.subr.bf16.mxu1 %v1409_v36 }
 0x116   : > { %v1200_v14 = vpack.c.bf16 %v563_v11, %v558_v13 }
 0x11c   : > { %1192 = vmatpush3.bf16.xpose.msra.mxu1 %v1191_v63 }
 0x11d   : > { %1193 = vmatprep.subr.bf16.mxu1 %v1409_v36 }
 0x124   : > { %1195 = vmatpush3.bf16.xpose.msra.mxu1 %v1194_v4 }
 0x125   : > { %1196 = vmatprep.subr.bf16.mxu1 %v1409_v36 }
 0x12c   : > { %1198 = vmatpush3.bf16.xpose.msra.mxu1 %v1197_v9 }
 0x12d   : > { %1199 = vmatprep.subr.bf16.mxu1 %v1409_v36 }
 0x134   : > { %1201 = vmatpush3.bf16.xpose.msra.mxu1 %v1200_v14 }
 0x13b   : > { %1125 = vmatmul.mubr.f32.vlgmr.msra.gmra.mrb[0].mxu1 %v566_v15 }
 0x20e   : > { %v633_v21 = vpop.f32.mrb[0].mxu1 }
 0x20f   : > { %v637_v22 = vmul.f32 0.088388346, %v633_v21  ;;  %v1126_v23 = vpop.f32.mrb[1].mxu1 }
 0x211   : > { %v645_v24 = vsel %vm644_vm3, %v637_v22, -inf }
 0x212   : > { %v649_v25 = vsel %vm648_vm4, %v645_v24, -inf  ;;  %646 = vst [vmem:[%s1590_s17] sm:$0xf] %v645_v24 }
 0x213   : > { %650 = vmax.xlane.f32.xlu0 %v649_v25 }
 0x2a0   : > { %v651_v28 = vpop.xlane.xlu0 %650 }
 0x2a1   : > { %v652_v29 = vmax.f32 %v647_v27, %v651_v28 }
 0x2a3   : > { %754 = vst.msk [vmem:[#allocation2] sm:$0xf] %vm336_vm1, %v652_v29  ;;  %vm653_vm5 = vcmp.eq.f32.partialorder %v652_v29, -inf }
 0x2a4   : > { %v654_v30 = vsel %vm653_vm5, 0.0, %v652_v29 }
 0x2a5   : > { %660 = vperm.xlu0 %1291, %v654_v30   ;;  %v655_v31 = vsub.f32 %v647_v27, %v654_v30 }
 0x2a7   : > { %v656_v39 = vmul.f32 1.442695, %v655_v31 }
 0x2aa   : > { %v758_v32 = vld [vmem:[#allocation2] sm:$0xf] }
 0x2ab   : > { %759 = vst.msk [vmem:[%s327_s23] sm:$0xf] %vm336_vm1, %v758_v32  ;;  %s1414_s23 = smov [#allocation5]  }
 0x2ac   : > { %s1301_s16 = sshll.u32 %s1414_s23, 4  ;;  %s1302_s16 = int_to_ptr.vmem [resolvable:$false] %s1301_s16 }
 0x2ad   : > { %s1303_s19 = scalar_lea.vmem %s1302_s16, 128  ;;  %p1304_p2 = scmp.lt.s32.totalorder %s793_s12, %s1302_s16 }
 0x2ae   : > { %p1305_p3 = scmp.lt.s32.totalorder %s1303_s19, %s1297_s22 }
 0x2b0   : > { %p1306_p5 = por %p1305_p3, %p1304_p2 }
 0x2b2   : > { %p1307_p6 = pnand %p1306_p5, %p1300_p1 }
 0x324   : > { %v661_v33 = vpop.permute.xlu0 %660 }
 0x325   : > { %v663_v34 = vsub.f32 %v645_v24, %v661_v33 }
 0x327   : > { %v664_v35 = vmul.f32 1.442695, %v663_v34 }
 0x329   : > { %1293 = vpow2.f32 %v664_v35 }
 0x32a   : > { %1295 = vpow2.f32 %v656_v39 }
 0x333   : > { %v1294_v36 = vpop.eup %1293 }
 0x334   : > { %1160 = vmatmul.mubr.f32.vlgmr.msra.gmra.mrb[16].mxu0 %v1294_v36  ;;  %v668_v38 = vsel %vm648_vm4, %v1294_v36, 0.0  ;;  %v1296_v40 = vpop.eup %1295 }
 0x335   : > { %669 = vadd.xlane.f32.xlu1 %v668_v38 }
 0x346   : > { %677 = vperm.xlu1 %1292, %v1296_v40  }
 0x347   : > { %1310 = shalt.err (!%p1307_p6)
}
 0x348   : > { %s1311_s17 = scalar_lea.hbm %s1614_s10, 64  ;;  %s1315_s23 = scalar_lea.hbm %s1703_s4, 128 }
 0x349   : > { %p1312_p7 = scmp.ne.s32.totalorder %s1614_s10, %s1311_s17  ;;  %p1316_p11 = scmp.lt.u32.totalorder %s1614_s10, %s1703_s4 }
 0x34a   : > { %p1317_p12 = scmp.lt.u32.totalorder %s1315_s23, %s1311_s17  ;;  %p1319_p0 = scmp.lt.u32.totalorder %s1311_s17, %s1614_s10 }
 0x34b   : > { %p1313_p9 = pnand %p1312_p7, %p1496_p4 }
 0x34c   : > { %p1318_p13 = por %p1317_p12, %p1316_p11 }
 0x34d   : > { %p1314_p10 = pneg %p1313_p9 }
 0x34e   : > { %p1320_p1 = por %p1319_p0, %p1318_p13 }
 0x350   : > { %p1321_p2 = pnand %p1320_p1, %p1314_p10 }
 0x352   : > { %1324 = shalt.err (!%p1321_p2)
}
 0x353   : > { %1226 = dma.vmem_to_hbm [thread:$0]  (%p1496_p4), %s793_s12, 64, %s1614_s10, %s765_s20   ;;  %v666_v37 = vld [vmem:[#allocation3] sm:$0xf]  ;;  %v674_v45 = vld [vmem:[#allocation4] sm:$0xf] }
 0x354   : > { %v667_v41 = vmul.f32 %v1296_v40, %v666_v37  ;;  %s1712_s19 = sshll.u32 %s1595_s18, 2  ;;  %s1713_s10 = sshll.u32 %s1584_s15, 2 }
 0x355   : > { %s331_s17 = scalar_lea.vmem %s1705_s6, %s1712_s19  ;;  %s314_s12 = scalar_lea.vmem [#allocation7], %s1713_s10 }
 0x356   : > { %s811_s18 = sshll.u32 %s314_s12, 4  ;;  %s1714_s20 = sshll.u32 %s1399_s27, 6  ;;  %s1652_s18 = int_to_ptr.vmem [resolvable:$true] %s811_s18 }
 0x357   : > { %s1650_s23 = scalar_lea.hbm %s1706_s7, %s1714_s20  ;;  %s778_s16 = scalar_lea.sflag [#allocation8], %s1584_s15 }
 0x358   : > { %s1325_s19 = scalar_lea.vmem %s1652_s18, 64  ;;  %s1415_s27 = smov [#allocation7]  }
 0x359   : > { %p1326_p3 = scmp.ne.s32.totalorder %s1652_s18, %s1325_s19  ;;  %s1329_s21 = sshll.u32 %s1415_s27, 4  ;;  %s1330_s21 = int_to_ptr.vmem [resolvable:$false] %s1329_s21 }
 0x35a   : > { %s1331_s22 = scalar_lea.vmem %s1330_s21, 128  ;;  %p1332_p7 = scmp.lt.s32.totalorder %s1652_s18, %s1330_s21 }
 0x35b   : > { %p1327_p5 = pnand %p1326_p3, %p1496_p4  ;;  %p1333_p9 = scmp.lt.s32.totalorder %s1331_s22, %s1325_s19 }
 0x35d   : > { %p1328_p6 = pneg %p1327_p5  ;;  %p1334_p10 = por %p1333_p9, %p1332_p7 }
 0x35f   : > { %p1335_p11 = pnand %p1334_p10, %p1328_p6 }
 0x3c2   : > { %v670_v42 = vpop.xlane.xlu1 %669 }
 0x3c3   : > { %v671_v43 = vadd.f32 %v670_v42, %v667_v41 }
 0x3c5   : > { %673 = vst.msk [vmem:[#allocation3] sm:$0xf] %vm336_vm1, %v671_v43 }
 0x3c6   : > { %v678_v46 = vpop.permute.xlu1 %677 }
 0x3c7   : > { %v680_v47 = vmul.f32 %v678_v46, %v674_v45 }
 0x3cc   : > { %v760_v44 = vld [vmem:[#allocation3] sm:$0xf] }
 0x3cd   : > { %761 = vst.msk [vmem:[%s331_s17] sm:$0xf] %vm336_vm1, %v760_v44 }
 0x407   : > { %v747_v48 = vpop.f32.mrb[16].mxu0 }
 0x408   : > { %v751_v49 = vadd.f32 %v747_v48, %v680_v47  ;;  %v1161_v50 = vpop.f32.mrb[17].mxu0 }
 0x40a   : > { %753 = vst.msk [vmem:[#allocation4] sm:$0xf] %vm339_vm6, %v751_v49 }
 0x411   : > { %v762_v51 = vld [vmem:[#allocation4] sm:$0xf] }
 0x412   : > { %763 = vst.msk [vmem:[%s314_s12] sm:$0xf] %vm339_vm6, %v762_v51 }
 0x413   : > { %1338 = shalt.err (!%p1335_p11)
}
 0x414   : > { %s1339_s15 = scalar_lea.hbm %s1650_s23, 64  ;;  %s1343_s12 = scalar_lea.hbm %s1706_s7, 128 }
 0x415   : > { %p1340_p12 = scmp.ne.s32.totalorder %s1650_s23, %s1339_s15  ;;  %p1344_p1 = scmp.lt.u32.totalorder %s1650_s23, %s1706_s7 }
 0x416   : > { %p1345_p2 = scmp.lt.u32.totalorder %s1343_s12, %s1339_s15  ;;  %p1347_p5 = scmp.lt.u32.totalorder %s1339_s15, %s1650_s23 }
 0x417   : > { %p1341_p13 = pnand %p1340_p12, %p1496_p4 }
 0x418   : > { %p1346_p3 = por %p1345_p2, %p1344_p1 }
 0x419   : > { %p1342_p0 = pneg %p1341_p13 }
 0x41a   : > { %p1348_p6 = por %p1347_p5, %p1346_p3 }
 0x41c   : > { %p1349_p7 = pnand %p1348_p6, %p1342_p0 }
 0x41e   : > { %1352 = shalt.err (!%p1349_p7)
}
 0x41f   : > { %1227 = dma.vmem_to_hbm [thread:$0]  (%p1496_p4), %s1652_s18, 64, %s1650_s23, %s778_s16  }
 0x420 PF: > { %p1237_p9 = scmp.ge.s32.totalorder %s1407_s29, 2  ;;  %s823_s8 = sand.u32 1, %s1387_s24  }
 0x421   : > { %s824_s19 = scalar_lea.sflag [#allocation6], %s823_s8 }
 0x422   : > { %p1231_p10 = pnand %p1237_p9, %p1503_p8 }
 0x424   : > { %1378 = dma.done.wait (!%p1231_p10), %s824_s19, 64  }
 0x425   : > { %1380 = vsyncadd (!%p1231_p10), %s824_s19, 4294967232  ;;  %s847_s27 = scalar_lea.sflag [#allocation8], %s823_s8 }
 0x426   : > { %1382 = dma.done.wait (!%p1231_p10), %s847_s27, 64  }
 0x427   : > { %1384 = vsyncadd (!%p1231_p10), %s847_s27, 4294967232  ;;  %s24_s29 = sadd.s32 1, %s1407_s29   ;;  %s1715_s24 = smov %s1391_s25 }
 0x428   : > { %p21_p11 = scmp.ge.s32.totalorder %s24_s29, 4   ;;  %s1716_s25 = smov %s1395_s26 }
 0x429   : > { %s1717_s26 = smov %s1509_s14  ;;  %s1718_s27 = smov %s1403_s28 }
 0x42a   : > { %s1719_s28 = smov %s1721_s9  ;;  %23 = sbr.rel (!%p21_p11) target bundleno = 6 (0x6), region = 120 }
 0x431   :  { %852 = vsyncpa [#allocation6], 1 }
 0x432   :  { %854 = vsyncpa [#allocation6 + $0x1], 1 }
 0x433   :  { %855 = vsyncpa [#allocation8], 1 }
 0x434   :  { %857 = vsyncpa [#allocation8 + $0x1], 1 }

</bundles_post_ra>
